<compile_context>
chip_gen: v7x
topology: tpu7x:2x2x1
jax: 0.10.0
libtpu: 0.0.40
codegen_flags: <defaults>
</compile_context>

<pallas_src>
import functools

import jax
import jax.numpy as jnp
from jax.experimental import pallas as pl
from jax.experimental.pallas import tpu as pltpu

C_OUT = 4          # config.numChannels
KZ = 3             # config.kernelSize
PAD = KZ // 2      # int(kz / 2)
STRIDE = 2
EPS = 1e-5         # nn.BatchNorm2d default eps

_LANE = 128
_TM_TARGET = 1024  # lane tile; 2 bufs * (TM*K*2B + TM*Cout*4B) ~= 0.2 MiB -> safe on v5e/v6e/v7x


def _round_up(x, m):
    return (x + m - 1) // m * m


def _bn_stats_kernel(w_ref, p_ref, g_ref, b_ref, scale_ref, shift_ref,
                     sum_acc, sq_acc, *, inv_m):
    """Pass 1: accumulate per-channel sum / sum-of-squares of conv over all M tiles;
    on the last tile fold mean/var/gamma/beta into a single (scale, shift)."""
    i = pl.program_id(0)

    @pl.when(i == 0)
    def _():
        sum_acc[...] = jnp.zeros_like(sum_acc)
        sq_acc[...] = jnp.zeros_like(sq_acc)

    # (Cout, K) @ (K, TM) -> (Cout, TM); bf16 operands, f32 MXU accumulation.
    conv = jnp.dot(w_ref[...], p_ref[...], preferred_element_type=jnp.float32)
    sum_acc[...] += jnp.sum(conv, axis=1, keepdims=True)          # lane-axis reduce
    sq_acc[...] += jnp.sum(conv * conv, axis=1, keepdims=True)

    @pl.when(i == pl.num_programs(0) - 1)
    def _():
        mean = sum_acc[...] * inv_m
        var = jnp.maximum(sq_acc[...] * inv_m - mean * mean, 0.0)  # f32 accumulators
        scale = g_ref[...] * jax.lax.rsqrt(var + EPS)              # EUP rsqrt
        scale_ref[...] = scale
        shift_ref[...] = b_ref[...] - mean * scale


def _bn_apply_kernel(w_ref, p_ref, scale_ref, shift_ref, o_ref):
    """Pass 2: recompute the cheap conv tile and apply folded BN + ReLU.
    Output layout (Cout, TM): M on the lane axis -> unmasked lane-dense stores."""
    conv = jnp.dot(w_ref[...], p_ref[...], preferred_element_type=jnp.float32)
    o_ref[...] = jnp.maximum(conv * scale_ref[...] + shift_ref[...], 0.0).astype(o_ref.dtype)


def _im2col_T_nchw(x, kz, stride, pad):
    """Transposed im2col: (N, Cin, H, W) -> (K, M) with K = Cin*kz*kz (Cin-major, matching
    PyTorch weight.reshape(Cout, -1)) and M = N*OH*OW (N-major)."""
    N, Cin, H, W = x.shape
    OH = (H + 2 * pad - kz) // stride + 1
    OW = (W + 2 * pad - kz) // stride + 1
    xp = jnp.pad(x, ((0, 0), (0, 0), (pad, pad), (pad, pad)))
    taps = []
    for ky in range(kz):
        for kx in range(kz):
            taps.append(xp[:, :, ky:ky + stride * OH:stride, kx:kx + stride * OW:stride])
    p = jnp.stack(taps, axis=0)                  # (kz*kz, N, Cin, OH, OW)
    p = p.transpose(2, 0, 1, 3, 4)               # (Cin, kz*kz, N, OH, OW)
    p = p.reshape(Cin * kz * kz, N * OH * OW)    # (K, M)
    return p, OH, OW


@jax.jit
def encode_block(x, weight, bias, gamma, beta):
    """x: (N, Cin, H, W) f32, weight: (Cout, Cin, kz, kz), bias/gamma/beta: (Cout,).
    `bias` is accepted for parity with nn.Conv2d but is mathematically dropped: a
    per-channel bias added before training-mode BatchNorm cancels exactly."""
    del bias
    N, Cin, H, W = x.shape
    K = Cin * KZ * KZ

    patches_t, OH, OW = _im2col_T_nchw(x, KZ, STRIDE, PAD)       # (K, M) f32
    M = N * OH * OW

    tm = min(_TM_TARGET, _round_up(M, _LANE))
    grid_m = pl.cdiv(M, tm)
    m_pad = grid_m * tm
    if m_pad != M:
        # Zero columns contribute 0 to both sum and sum-of-squares -> stats stay exact.
        patches_t = jnp.pad(patches_t, ((0, 0), (0, m_pad - M)))

    # bf16 MXU operands (f32 accumulate); halves patch-matrix HBM traffic.
    p_bf16 = patches_t.astype(jnp.bfloat16)
    w_mat = weight.reshape(C_OUT, K).astype(jnp.bfloat16)        # (Cout, K)
    g_col = gamma.reshape(C_OUT, 1).astype(jnp.float32)
    be_col = beta.reshape(C_OUT, 1).astype(jnp.float32)

    w_spec = pl.BlockSpec((C_OUT, K), lambda i: (0, 0))
    p_spec = pl.BlockSpec((K, tm), lambda i: (0, i))
    col_spec = pl.BlockSpec((C_OUT, 1), lambda i: (0, 0))

    # ---- pass 1: per-channel batch statistics -> folded (scale, shift) ----
    scale, shift = pl.pallas_call(
        functools.partial(_bn_stats_kernel, inv_m=1.0 / float(M)),
        out_shape=(jax.ShapeDtypeStruct((C_OUT, 1), jnp.float32),
                   jax.ShapeDtypeStruct((C_OUT, 1), jnp.float32)),
        grid_spec=pltpu.PrefetchScalarGridSpec(
            num_scalar_prefetch=0,
            grid=(grid_m,),
            in_specs=[w_spec, p_spec, col_spec, col_spec],
            out_specs=[col_spec, col_spec],
            scratch_shapes=[pltpu.VMEM((C_OUT, 1), jnp.float32),
                            pltpu.VMEM((C_OUT, 1), jnp.float32)]),
        compiler_params=pltpu.CompilerParams(
            dimension_semantics=("arbitrary",),     # scratch accumulators carry across tiles
            vmem_limit_bytes=32 * 1024 * 1024),
        cost_estimate=pl.CostEstimate(
            flops=2 * m_pad * K * C_OUT + 3 * m_pad * C_OUT,
            transcendentals=C_OUT,
            bytes_accessed=m_pad * K * 2 + C_OUT * K * 2 + 6 * C_OUT * 4),
    )(w_mat, p_bf16, g_col, be_col)

    # ---- pass 2: conv tile + folded BN + ReLU, lane-dense (Cout, M) output ----
    out_t = pl.pallas_call(
        _bn_apply_kernel,
        out_shape=jax.ShapeDtypeStruct((C_OUT, m_pad), jnp.float32),
        grid_spec=pltpu.PrefetchScalarGridSpec(
            num_scalar_prefetch=0,
            grid=(grid_m,),
            in_specs=[w_spec, p_spec, col_spec, col_spec],
            out_specs=pl.BlockSpec((C_OUT, tm), lambda i: (0, i))),
        compiler_params=pltpu.CompilerParams(
            dimension_semantics=("parallel",),      # tiles independent -> megacore-splittable
            vmem_limit_bytes=32 * 1024 * 1024),
        cost_estimate=pl.CostEstimate(
            flops=2 * m_pad * K * C_OUT + 2 * m_pad * C_OUT,
            transcendentals=0,
            bytes_accessed=m_pad * K * 2 + m_pad * C_OUT * 4 + C_OUT * K * 2 + 2 * C_OUT * 4),
    )(w_mat, p_bf16, scale, shift)

    # (Cout, M) -> NCHW
    return out_t[:, :M].reshape(C_OUT, N, OH, OW).transpose(1, 0, 2, 3)


def _reference(x, weight, bias, gamma, beta):
    # Conv (bf16 operands, f32 accumulation, matching the kernel's MXU precision) + bias
    # + training-mode BN + ReLU.  The bias is included here to demonstrate that dropping
    # it inside the kernel is exact (it cancels under batch normalization).
    y = jax.lax.conv_general_dilated(
        x.astype(jnp.bfloat16), weight.astype(jnp.bfloat16),
        window_strides=(STRIDE, STRIDE),
        padding=((PAD, PAD), (PAD, PAD)),
        dimension_numbers=("NCHW", "OIHW", "NCHW"),
        preferred_element_type=jnp.float32,
    ) + bias.reshape(1, C_OUT, 1, 1)
    mean = jnp.mean(y, axis=(0, 2, 3), keepdims=True)
    var = jnp.mean((y - mean) ** 2, axis=(0, 2, 3), keepdims=True)
    yn = (y - mean) * jax.lax.rsqrt(var + EPS)
    yn = yn * gamma.reshape(1, C_OUT, 1, 1) + beta.reshape(1, C_OUT, 1, 1)
    return jnp.maximum(yn, 0.0)


if __name__ == "__main__":
    key = jax.random.PRNGKey(0)
    k_x, k_w, k_b, k_g, k_be = jax.random.split(key, 5)

    N, C_IN, H, W = 2, 4, 16, 16
    x = jax.random.normal(k_x, (N, C_IN, H, W), dtype=jnp.float32)

    # Deterministic parameter init (synthetic, not a checkpoint load).
    weight = jax.random.normal(k_w, (C_OUT, C_IN, KZ, KZ), dtype=jnp.float32) * 0.1
    bias = jax.random.normal(k_b, (C_OUT,), dtype=jnp.float32) * 0.1
    gamma = 1.0 + 0.1 * jax.random.normal(k_g, (C_OUT,), dtype=jnp.float32)
    beta = 0.1 * jax.random.normal(k_be, (C_OUT,), dtype=jnp.float32)

    out = jax.block_until_ready(encode_block(x, weight, bias, gamma, beta))
    ref = jax.block_until_ready(_reference(x, weight, bias, gamma, beta))

    assert out.shape == (N, C_OUT, H // 2, W // 2), out.shape
    max_err = float(jnp.max(jnp.abs(out - ref)))
    assert jnp.allclose(out, ref, atol=1e-3, rtol=1e-3), max_err

    print("KERNEL_OK")
</pallas_src>

<mosaic_0001>
module attributes {stable_mosaic.version = 11 : i64} {
  func.func @_bn_stats_kernel(%arg0: i32, %arg1: memref<4x36xbf16, #tpu.memory_space<vmem>>, %arg2: memref<36x128xbf16, #tpu.memory_space<vmem>>, %arg3: memref<4x1xf32, #tpu.memory_space<vmem>>, %arg4: memref<4x1xf32, #tpu.memory_space<vmem>>, %arg5: memref<4x1xf32, #tpu.memory_space<vmem>>, %arg6: memref<4x1xf32, #tpu.memory_space<vmem>>, %arg7: memref<4x1xf32, #tpu.memory_space<vmem>>, %arg8: memref<4x1xf32, #tpu.memory_space<vmem>>) attributes {dimension_semantics = [#tpu.dimension_semantics<arbitrary>], iteration_bounds = array<i64: 1>, scalar_prefetch = 0 : i64, scratch_operands = 2 : i64, tpu.core_type = #tpu.core_type<tc>, window_params = [{pipeline_mode = #tpu.pipeline_mode<synchronous>, transform_indices = @transform_0, window_bounds = array<i64: 4, 36>}, {transform_indices = @transform_1, window_bounds = array<i64: 36, 128>}, {pipeline_mode = #tpu.pipeline_mode<synchronous>, transform_indices = @transform_2, window_bounds = array<i64: 4, 1>}, {pipeline_mode = #tpu.pipeline_mode<synchronous>, transform_indices = @transform_3, window_bounds = array<i64: 4, 1>}, {pipeline_mode = #tpu.pipeline_mode<synchronous>, transform_indices = @transform_4, window_bounds = array<i64: 4, 1>}, {pipeline_mode = #tpu.pipeline_mode<synchronous>, transform_indices = @transform_5, window_bounds = array<i64: 4, 1>}]} {
    %c0_i32 = arith.constant 0 : i32
    %0 = arith.cmpi eq, %arg0, %c0_i32 : i32
    %1 = arith.extui %0 : i1 to i32
    %c0_i32_0 = arith.constant 0 : i32
    %2 = arith.cmpi ne, %1, %c0_i32_0 : i32
    scf.if %2 {
      %cst_16 = arith.constant 0.000000e+00 : f32
      %20 = vector.broadcast %cst_16 : f32 to vector<4x1xf32>
      %c0_17 = arith.constant 0 : index
      %c0_18 = arith.constant 0 : index
      %21 = vector.load %arg7[%c0_17, %c0_18] : memref<4x1xf32, #tpu.memory_space<vmem>>, vector<4x1xf32>
      tpu.vector_store %arg7[%c0_17, %c0_18], %20 {strides = array<i32>} : memref<4x1xf32, #tpu.memory_space<vmem>>, vector<4x1xf32>,
      %cst_19 = arith.constant 0.000000e+00 : f32
      %22 = vector.broadcast %cst_19 : f32 to vector<4x1xf32>
      %c0_20 = arith.constant 0 : index
      %c0_21 = arith.constant 0 : index
      %23 = vector.load %arg8[%c0_20, %c0_21] : memref<4x1xf32, #tpu.memory_space<vmem>>, vector<4x1xf32>
      tpu.vector_store %arg8[%c0_20, %c0_21], %22 {strides = array<i32>} : memref<4x1xf32, #tpu.memory_space<vmem>>, vector<4x1xf32>,
    } else {
    }
    %c0 = arith.constant 0 : index
    %c0_1 = arith.constant 0 : index
    %3 = vector.load %arg1[%c0, %c0_1] : memref<4x36xbf16, #tpu.memory_space<vmem>>, vector<4x36xbf16>
    %c0_2 = arith.constant 0 : index
    %c0_3 = arith.constant 0 : index
    %4 = vector.load %arg2[%c0_2, %c0_3] : memref<36x128xbf16, #tpu.memory_space<vmem>>, vector<36x128xbf16>
    %cst = arith.constant dense<0.000000e+00> : vector<4x128xf32>
    %5 = tpu.matmul %3, %4, %cst {dimension_numbers = #tpu.dot_dimension_numbers<[1], [0], [0], [1], [0, 0, 1, 1], [], []>} : vector<4x36xbf16>, vector<36x128xbf16>, vector<4x128xf32> -> vector<4x128xf32>
    %c0_4 = arith.constant 0 : index
    %c0_5 = arith.constant 0 : index
    %6 = vector.load %arg7[%c0_4, %c0_5] : memref<4x1xf32, #tpu.memory_space<vmem>>, vector<4x1xf32>
    %cst_6 = arith.constant dense<0.000000e+00> : vector<4xf32>
    %7 = vector.multi_reduction <add>, %5, %cst_6 [1] : vector<4x128xf32> to vector<4xf32>
    %8 = vector.shape_cast %7 : vector<4xf32> to vector<4x1xf32>
    %9 = arith.addf %6, %8 : vector<4x1xf32>
    %c0_7 = arith.constant 0 : index
    %c0_8 = arith.constant 0 : index
    %10 = vector.load %arg7[%c0_7, %c0_8] : memref<4x1xf32, #tpu.memory_space<vmem>>, vector<4x1xf32>
    tpu.vector_store %arg7[%c0_7, %c0_8], %9 {strides = array<i32>} : memref<4x1xf32, #tpu.memory_space<vmem>>, vector<4x1xf32>,
    %c0_9 = arith.constant 0 : index
    %c0_10 = arith.constant 0 : index
    %11 = vector.load %arg8[%c0_9, %c0_10] : memref<4x1xf32, #tpu.memory_space<vmem>>, vector<4x1xf32>
    %12 = arith.mulf %5, %5 : vector<4x128xf32>
    %cst_11 = arith.constant dense<0.000000e+00> : vector<4xf32>
    %13 = vector.multi_reduction <add>, %12, %cst_11 [1] : vector<4x128xf32> to vector<4xf32>
    %14 = vector.shape_cast %13 : vector<4xf32> to vector<4x1xf32>
    %15 = arith.addf %11, %14 : vector<4x1xf32>
    %c0_12 = arith.constant 0 : index
    %c0_13 = arith.constant 0 : index
    %16 = vector.load %arg8[%c0_12, %c0_13] : memref<4x1xf32, #tpu.memory_space<vmem>>, vector<4x1xf32>
    tpu.vector_store %arg8[%c0_12, %c0_13], %15 {strides = array<i32>} : memref<4x1xf32, #tpu.memory_space<vmem>>, vector<4x1xf32>,
    %c0_i32_14 = arith.constant 0 : i32
    %17 = arith.cmpi eq, %arg0, %c0_i32_14 : i32
    %18 = arith.extui %17 : i1 to i32
    %c0_i32_15 = arith.constant 0 : i32
    %19 = arith.cmpi ne, %18, %c0_i32_15 : i32
    scf.if %19 {
      %c0_16 = arith.constant 0 : index
      %c0_17 = arith.constant 0 : index
      %20 = vector.load %arg7[%c0_16, %c0_17] : memref<4x1xf32, #tpu.memory_space<vmem>>, vector<4x1xf32>
      %cst_18 = arith.constant 7.812500e-03 : f32
      %21 = vector.broadcast %cst_18 : f32 to vector<4x1xf32>
      %22 = arith.mulf %20, %21 : vector<4x1xf32>
      %c0_19 = arith.constant 0 : index
      %c0_20 = arith.constant 0 : index
      %23 = vector.load %arg8[%c0_19, %c0_20] : memref<4x1xf32, #tpu.memory_space<vmem>>, vector<4x1xf32>
      %cst_21 = arith.constant 7.812500e-03 : f32
      %24 = vector.broadcast %cst_21 : f32 to vector<4x1xf32>
      %25 = arith.mulf %23, %24 : vector<4x1xf32>
      %26 = arith.mulf %22, %22 : vector<4x1xf32>
      %27 = arith.subf %25, %26 : vector<4x1xf32>
      %cst_22 = arith.constant 0.000000e+00 : f32
      %28 = vector.broadcast %cst_22 : f32 to vector<4x1xf32>
      %29 = arith.maximumf %27, %28 : vector<4x1xf32>
      %c0_23 = arith.constant 0 : index
      %c0_24 = arith.constant 0 : index
      %30 = vector.load %arg3[%c0_23, %c0_24] : memref<4x1xf32, #tpu.memory_space<vmem>>, vector<4x1xf32>
      %cst_25 = arith.constant 9.99999974E-6 : f32
      %31 = vector.broadcast %cst_25 : f32 to vector<4x1xf32>
      %32 = arith.addf %29, %31 : vector<4x1xf32>
      %33 = math.rsqrt %32 : vector<4x1xf32>
      %34 = arith.mulf %30, %33 : vector<4x1xf32>
      %c0_26 = arith.constant 0 : index
      %c0_27 = arith.constant 0 : index
      %35 = vector.load %arg5[%c0_26, %c0_27] : memref<4x1xf32, #tpu.memory_space<vmem>>, vector<4x1xf32>
      tpu.vector_store %arg5[%c0_26, %c0_27], %34 {strides = array<i32>} : memref<4x1xf32, #tpu.memory_space<vmem>>, vector<4x1xf32>,
      %c0_28 = arith.constant 0 : index
      %c0_29 = arith.constant 0 : index
      %36 = vector.load %arg4[%c0_28, %c0_29] : memref<4x1xf32, #tpu.memory_space<vmem>>, vector<4x1xf32>
      %37 = arith.mulf %22, %34 : vector<4x1xf32>
      %38 = arith.subf %36, %37 : vector<4x1xf32>
      %c0_30 = arith.constant 0 : index
      %c0_31 = arith.constant 0 : index
      %39 = vector.load %arg6[%c0_30, %c0_31] : memref<4x1xf32, #tpu.memory_space<vmem>>, vector<4x1xf32>
      tpu.vector_store %arg6[%c0_30, %c0_31], %38 {strides = array<i32>} : memref<4x1xf32, #tpu.memory_space<vmem>>, vector<4x1xf32>,
    } else {
    }
    return
  }
  func.func @transform_0(%arg0: i32) -> (i32, i32) {
    %c0_i32 = arith.constant 0 : i32
    %c0_i32_0 = arith.constant 0 : i32
    %c0_i32_1 = arith.constant 0 : i32
    return %c0_i32, %c0_i32_0 : i32, i32
  }
  func.func @transform_1(%arg0: i32) -> (i32, i32) {
    %c0_i32 = arith.constant 0 : i32
    %c0_i32_0 = arith.constant 0 : i32
    return %c0_i32, %arg0 : i32, i32
  }
  func.func @transform_2(%arg0: i32) -> (i32, i32) {
    %c0_i32 = arith.constant 0 : i32
    %c0_i32_0 = arith.constant 0 : i32
    %c0_i32_1 = arith.constant 0 : i32
    return %c0_i32, %c0_i32_0 : i32, i32
  }
  func.func @transform_3(%arg0: i32) -> (i32, i32) {
    %c0_i32 = arith.constant 0 : i32
    %c0_i32_0 = arith.constant 0 : i32
    %c0_i32_1 = arith.constant 0 : i32
    return %c0_i32, %c0_i32_0 : i32, i32
  }
  func.func @transform_4(%arg0: i32) -> (i32, i32) {
    %c0_i32 = arith.constant 0 : i32
    %c0_i32_0 = arith.constant 0 : i32
    %c0_i32_1 = arith.constant 0 : i32
    return %c0_i32, %c0_i32_0 : i32, i32
  }
  func.func @transform_5(%arg0: i32) -> (i32, i32) {
    %c0_i32 = arith.constant 0 : i32
    %c0_i32_0 = arith.constant 0 : i32
    %c0_i32_1 = arith.constant 0 : i32
    return %c0_i32, %c0_i32_0 : i32, i32
  }
}

module attributes {stable_mosaic.version = 11 : i64} {
  func.func @_bn_apply_kernel(%arg0: i32, %arg1: memref<4x36xbf16, #tpu.memory_space<vmem>>, %arg2: memref<36x128xbf16, #tpu.memory_space<vmem>>, %arg3: memref<4x1xf32, #tpu.memory_space<vmem>>, %arg4: memref<4x1xf32, #tpu.memory_space<vmem>>, %arg5: memref<4x128xf32, #tpu.memory_space<vmem>>) attributes {dimension_semantics = [#tpu.dimension_semantics<parallel>], iteration_bounds = array<i64: 1>, scalar_prefetch = 0 : i64, scratch_operands = 0 : i64, tpu.core_type = #tpu.core_type<tc>, window_params = [{pipeline_mode = #tpu.pipeline_mode<synchronous>, transform_indices = @transform_0, window_bounds = array<i64: 4, 36>}, {transform_indices = @transform_1, window_bounds = array<i64: 36, 128>}, {pipeline_mode = #tpu.pipeline_mode<synchronous>, transform_indices = @transform_2, window_bounds = array<i64: 4, 1>}, {pipeline_mode = #tpu.pipeline_mode<synchronous>, transform_indices = @transform_3, window_bounds = array<i64: 4, 1>}, {transform_indices = @transform_4, window_bounds = array<i64: 4, 128>}]} {
    %c0 = arith.constant 0 : index
    %c0_0 = arith.constant 0 : index
    %0 = vector.load %arg1[%c0, %c0_0] : memref<4x36xbf16, #tpu.memory_space<vmem>>, vector<4x36xbf16>
    %c0_1 = arith.constant 0 : index
    %c0_2 = arith.constant 0 : index
    %1 = vector.load %arg2[%c0_1, %c0_2] : memref<36x128xbf16, #tpu.memory_space<vmem>>, vector<36x128xbf16>
    %cst = arith.constant dense<0.000000e+00> : vector<4x128xf32>
    %2 = tpu.matmul %0, %1, %cst {dimension_numbers = #tpu.dot_dimension_numbers<[1], [0], [0], [1], [0, 0, 1, 1], [], []>} : vector<4x36xbf16>, vector<36x128xbf16>, vector<4x128xf32> -> vector<4x128xf32>
    %c0_3 = arith.constant 0 : index
    %c0_4 = arith.constant 0 : index
    %3 = vector.load %arg3[%c0_3, %c0_4] : memref<4x1xf32, #tpu.memory_space<vmem>>, vector<4x1xf32>
    %4 = vector.broadcast %3 : vector<4x1xf32> to vector<4x128xf32>
    %5 = arith.mulf %2, %4 : vector<4x128xf32>
    %c0_5 = arith.constant 0 : index
    %c0_6 = arith.constant 0 : index
    %6 = vector.load %arg4[%c0_5, %c0_6] : memref<4x1xf32, #tpu.memory_space<vmem>>, vector<4x1xf32>
    %7 = vector.broadcast %6 : vector<4x1xf32> to vector<4x128xf32>
    %8 = arith.addf %5, %7 : vector<4x128xf32>
    %cst_7 = arith.constant 0.000000e+00 : f32
    %9 = vector.broadcast %cst_7 : f32 to vector<4x128xf32>
    %10 = arith.maximumf %8, %9 : vector<4x128xf32>
    %c0_8 = arith.constant 0 : index
    %c0_9 = arith.constant 0 : index
    %11 = vector.load %arg5[%c0_8, %c0_9] : memref<4x128xf32, #tpu.memory_space<vmem>>, vector<4x128xf32>
    tpu.vector_store %arg5[%c0_8, %c0_9], %10 {strides = array<i32>} : memref<4x128xf32, #tpu.memory_space<vmem>>, vector<4x128xf32>,
    return
  }
  func.func @transform_0(%arg0: i32) -> (i32, i32) {
    %c0_i32 = arith.constant 0 : i32
    %c0_i32_0 = arith.constant 0 : i32
    %c0_i32_1 = arith.constant 0 : i32
    return %c0_i32, %c0_i32_0 : i32, i32
  }
  func.func @transform_1(%arg0: i32) -> (i32, i32) {
    %c0_i32 = arith.constant 0 : i32
    %c0_i32_0 = arith.constant 0 : i32
    return %c0_i32, %arg0 : i32, i32
  }
  func.func @transform_2(%arg0: i32) -> (i32, i32) {
    %c0_i32 = arith.constant 0 : i32
    %c0_i32_0 = arith.constant 0 : i32
    %c0_i32_1 = arith.constant 0 : i32
    return %c0_i32, %c0_i32_0 : i32, i32
  }
  func.func @transform_3(%arg0: i32) -> (i32, i32) {
    %c0_i32 = arith.constant 0 : i32
    %c0_i32_0 = arith.constant 0 : i32
    %c0_i32_1 = arith.constant 0 : i32
    return %c0_i32, %c0_i32_0 : i32, i32
  }
  func.func @transform_4(%arg0: i32) -> (i32, i32) {
    %c0_i32 = arith.constant 0 : i32
    %c0_i32_0 = arith.constant 0 : i32
    return %c0_i32, %arg0 : i32, i32
  }
}

</mosaic_0001>

<bundles_post_ra>
// kernel: encode_block.3
= control target key start
LH: loop header
LB: loop body
LE: loop exit
PB: predicated region body
PF: predicated region fallthrough
CT: control target
= control target key end

     0   :  { %v132_v0 = vmov 0.0   ;;  %vm133_vm0 = vmmov 0   ;;  %v134_v2 = vmov 0   ;;  %vm43_vm1 = vcmask 1041408   ;;  %s181_s1 = inlined_call_operand.vmem [shape: bf16[36,128], index: 1, kind: input, shape index: {}]   ;;  %s182_s2 = inlined_call_operand.vmem [shape: f32[4,1], index: 2, kind: input, shape index: {}]   ;;  %s183_s3 = inlined_call_operand.vmem [shape: f32[4,1], index: 3, kind: input, shape index: {}]   ;;  %s184_s0 = inlined_call_operand.vmem [shape: bf16[4,36], index: 0, kind: input, shape index: {}]   ;;  %s185_s4 = inlined_call_operand.vmem [shape: f32[4,128], index: 4, kind: output, shape index: {}]  }
   0x1   :  { %115 = vmatprep.subr.bf16.mxu0 %v132_v0  ;;  %v129_v1 = vld [vmem:[%s181_s1] sm:$0xff]   ;;  %121 = vmatprep.mubr.msk.bf16.mxu0 %vm133_vm0, %v132_v0  ;;  %v130_v3 = vld [vmem:[%s181_s1 + $0x8] sm:$0xff]   ;;  %v131_v4 = vld [vmem:[%s181_s1 + $0x10] ss:$0 sps:$4 sm:$0x33]   ;;  %vm39_vm2 = vcmask 293888  }
   0x2   :  { %128 = vset.pattern.permute.xlu0 %v134_v2  ;;  %116 = vmatpush3.bf16.msra.mxu0 %v129_v1  ;;  %v87_v5 = vld [vmem:[%s182_s2] sm:$0xf]  ;;  %v45_v7 = vsel %vm43_vm1, %v131_v4, 0 }
   0x3   :  { %117 = vmatprep.subr.bf16.mxu0 %v132_v0  ;;  %90 = vperm.xlu0 %128, %v87_v5   ;;  %v94_v6 = vld [vmem:[%s183_s3] sm:$0xf] }
   0x4   :  { %v18_v8 = vld [vmem:[%s184_s0] sm:$0x3] }
   0x6   :  { %118 = vmatpush3.bf16.msra.mxu0 %v130_v3 }
   0x7   :  { %119 = vmatprep.subr.bf16.mxu0 %v132_v0  ;;  %97 = vperm.xlu0 %128, %v94_v6  }
   0xa   :  { %120 = vmatpush3.bf16.msra.mxu0 %v45_v7 }
   0xd   :  { %122 = vmatmul.mubr.msk.bf16.vlgmr.msra.gmra.mrb[0].mxu0 %vm39_vm2, %v18_v8 }
  0x82   :  { %v91_v9 = vpop.permute.xlu0 %90 }
  0x86   :  { %v98_v13 = vpop.permute.xlu0 %97 }
  0xe0   :  { %v81_v10 = vpop.f32.mrb[0].mxu0 }
  0xe1   :  { %v93_v11 = vmul.f32 %v91_v9, %v81_v10  ;;  %v123_v12 = vpop.f32.mrb[1].mxu0 }
  0xe2   :  { %v84_v14 = vpop.f32.mrb[2].mxu0 }
  0xe3   :  { %v100_v15 = vadd.f32 %v98_v13, %v93_v11  ;;  %v124_v16 = vpop.f32.mrb[3].mxu0 }
  0xe5   :  { %v101_v17 = vmax.f32 %v100_v15, 0.0 }
  0xe7   :  { %102 = vst [vmem:[%s185_s4] sm:$0xf] %v101_v17 }

// kernel: encode_block.2
= control target key start
LH: loop header
LB: loop body
LE: loop exit
PB: predicated region body
PF: predicated region fallthrough
CT: control target
= control target key end

     0   :  { %v163_v0 = vmov 0.0   ;;  %vm164_vm0 = vmmov 0   ;;  %vm52_vm1 = vcmask 1041408   ;;  %vm48_vm2 = vcmask 293888   ;;  %s225_s1 = inlined_call_operand.vmem [shape: bf16[36,128], index: 1, kind: input, shape index: {}]   ;;  %s226_s0 = inlined_call_operand.vmem [shape: bf16[4,36], index: 0, kind: input, shape index: {}]   ;;  %s227_s2 = inlined_call_operand.vmem [shape: f32[4,1], index: 2, kind: input, shape index: {}]   ;;  %s228_s3 = inlined_call_operand.vmem [shape: f32[4,1], index: 3, kind: input, shape index: {}]   ;;  %s229_s4 = inlined_call_operand.vmem [shape: f32[4,1], index: 4, kind: output, shape index: {0}]   ;;  %s230_s5 = inlined_call_operand.vmem [shape: f32[4,1], index: 5, kind: output, shape index: {1}]  }
   0x1   :  { %146 = vmatprep.subr.bf16.mxu0 %v163_v0  ;;  %v158_v1 = vld [vmem:[%s225_s1] sm:$0xff]   ;;  %152 = vmatprep.mubr.msk.bf16.mxu0 %vm164_vm0, %v163_v0  ;;  %v159_v2 = vld [vmem:[%s225_s1 + $0x8] sm:$0xff]   ;;  %v160_v3 = vld [vmem:[%s225_s1 + $0x10] ss:$0 sps:$4 sm:$0x33]   ;;  %vm24_vm3 = vcmask 3072  }
   0x2   :  { %147 = vmatpush3.bf16.msra.mxu0 %v158_v1  ;;  %v54_v4 = vsel %vm52_vm1, %v160_v3, 0  ;;  %v27_v5 = vld [vmem:[%s226_s0] sm:$0x3]  ;;  %25 = vst.msk [vmem:[#allocation2] sm:$0xf] %vm24_vm3, %v163_v0  ;;  %vm97_vm4 = vcmask 1043456  }
   0x3   :  { %148 = vmatprep.subr.bf16.mxu0 %v163_v0  ;;  %26 = vst.msk [vmem:[#allocation3] sm:$0xf] %vm24_vm3, %v163_v0  ;;  %v121_v27 = vld [vmem:[%s227_s2] sm:$0xf] }
   0x4   :  { %v126_v30 = vld [vmem:[%s228_s3] sm:$0xf] }
   0x6   :  { %149 = vmatpush3.bf16.msra.mxu0 %v159_v2 }
   0x7   :  { %150 = vmatprep.subr.bf16.mxu0 %v163_v0 }
   0x9   :  { %v96_v13 = vld [vmem:[#allocation2] sm:$0xf] }
   0xa   :  { %151 = vmatpush3.bf16.msra.mxu0 %v54_v4  ;;  %v104_v16 = vld [vmem:[#allocation3] sm:$0xf] }
   0xd   :  { %153 = vmatmul.mubr.msk.bf16.vlgmr.msra.gmra.mrb[0].mxu0 %vm48_vm2, %v27_v5 }
  0xe0   :  { %v90_v6 = vpop.f32.mrb[0].mxu0 }
  0xe1   :  { %v105_v7 = vmul.f32 %v90_v6, %v90_v6  ;;  %v154_v8 = vpop.f32.mrb[1].mxu0  ;;  %v98_v9 = vsel %vm97_vm4, %v90_v6, 0.0 }
  0xe2   :  { %99 = vadd.xlane.f32.xlu0 %v98_v9  ;;  %v93_v10 = vpop.f32.mrb[2].mxu0 }
  0xe3   :  { %v155_v11 = vpop.f32.mrb[3].mxu0  ;;  %v106_v12 = vsel %vm97_vm4, %v105_v7, 0.0 }
  0xe6   :  { %107 = vadd.xlane.f32.xlu0 %v106_v12 }
 0x16f   :  { %v100_v14 = vpop.xlane.xlu0 %99 }
 0x170   :  { %v101_v15 = vadd.f32 %v100_v14, %v96_v13 }
 0x172   :  { %103 = vst.msk [vmem:[#allocation2] sm:$0xf] %vm24_vm3, %v101_v15 }
 0x173   :  { %v108_v17 = vpop.xlane.xlu0 %107 }
 0x174   :  { %v109_v18 = vadd.f32 %v108_v17, %v104_v16 }
 0x176   :  { %110 = vst.msk [vmem:[#allocation3] sm:$0xf] %vm24_vm3, %v109_v18 }
 0x179   :  { %v114_v19 = vld [vmem:[#allocation2] sm:$0xf] }
 0x17a   :  { %v115_v20 = vmul.f32 0.0078125, %v114_v19 }
 0x17c   :  { %v118_v22 = vmul.f32 %v115_v20, %v115_v20 }
 0x17d   :  { %v116_v21 = vld [vmem:[#allocation3] sm:$0xf] }
 0x17e   :  { %v117_v23 = vmul.f32 0.0078125, %v116_v21 }
 0x180   :  { %v119_v24 = vsub.f32 %v117_v23, %v118_v22 }
 0x182   :  { %v120_v25 = vmax.f32 %v119_v24, 0.0 }
 0x184   :  { %v122_v26 = vadd.f32 1e-05, %v120_v25 }
 0x186   :  { %161 = vrsqrt.f32 %v122_v26 }
 0x190   :  { %v162_v28 = vpop.eup %161 }
 0x191   :  { %v124_v29 = vmul.f32 %v162_v28, %v121_v27 }
 0x193   :  { %125 = vst.msk [vmem:[%s229_s4] sm:$0xf] %vm24_vm3, %v124_v29  ;;  %v127_v31 = vmul.f32 %v124_v29, %v115_v20 }
 0x195   :  { %v128_v32 = vsub.f32 %v126_v30, %v127_v31 }
 0x197   :  { %129 = vst.msk [vmem:[%s230_s5] sm:$0xf] %vm24_vm3, %v128_v32 }

</bundles_post_ra>
